<compile_context>
chip_gen: v7x
topology: tpu7x:2x2x1
jax: 0.10.0
libtpu: 0.0.40
codegen_flags: <defaults>
</compile_context>

<pallas_src>
import jax
import jax.numpy as jnp
from jax import lax
from jax.experimental import pallas as pl
from jax.experimental.pallas import tpu as pltpu

# Model hyper-parameters (from the PyTorch script)
VOCAB_SIZE = 81
EMBEDDING_DIM = 64
HIDDEN_SIZE = 32
NUM_LAYERS = 1  # single layer only (matches num_layers=1)

# Small example shapes
BATCH = 2
SEQ_LEN = 8


def _lstm_fc_kernel(tok_ref, emb_ref, w_ih_ref, w_hh_ref, b_ref,
                    w_fc_ref, b_fc_ref, out_ref):
    """tok_ref: (T*Bp, 1) int32 time-major token ids;
    emb_ref: (Vp, E); w_ih_ref: (E, 4H); w_hh_ref: (H, 4H); b_ref: (1, 4H);
    w_fc_ref: (H, Vp); b_fc_ref: (1, Vp); out_ref: (Bp, Vp)."""
    TB = tok_ref.shape[0]
    Bp = out_ref.shape[0]
    T = TB // Bp
    H = w_hh_ref.shape[0]
    Vp_emb = emb_ref.shape[0]

    w_hh_t = w_hh_ref[...]                               # (H, 4H)  resident in vregs
    w_fc_t = w_fc_ref[...]                               # (H, Vp)
    b_fc = b_fc_ref[...]                                 # (1, Vp)

    # --- In-kernel embedding lookup: exact row selection via one-hot MXU matmul. ---
    tok = tok_ref[...]                                                      # (TB, 1) i32
    onehot = (tok == lax.broadcasted_iota(jnp.int32, (TB, Vp_emb), 1)
              ).astype(jnp.float32)                                         # (TB, Vp)
    x = jnp.dot(onehot, emb_ref[...], preferred_element_type=jnp.float32)   # (TB, E)

    # --- One packed MXU pass for every timestep's input contribution, bias folded in. ---
    gx = jnp.dot(x, w_ih_ref[...],
                 preferred_element_type=jnp.float32) + b_ref[...]           # (TB, 4H)

    h = jnp.zeros((Bp, H), jnp.float32)
    c = jnp.zeros((Bp, H), jnp.float32)

    # --- Fully unrolled recurrence (T is a small static constant); gx stays in vregs
    # and each step reads a static, sublane-aligned (Bp, 4H) slice of it. ---
    for t in range(T):
        g = gx[t * Bp:(t + 1) * Bp, :] + jnp.dot(
            h, w_hh_t, preferred_element_type=jnp.float32)                  # (Bp, 4H)
        # Two full-vreg transcendentals instead of four quarter-width ones.
        s = jax.nn.sigmoid(g)
        tg = jnp.tanh(g)
        i_g = s[:, 0 * H:1 * H]
        f_g = s[:, 1 * H:2 * H]
        g_g = tg[:, 2 * H:3 * H]
        o_g = s[:, 3 * H:4 * H]
        c = f_g * c + i_g * g_g
        h = o_g * jnp.tanh(c)

    # --- Final FC on the last hidden state -> lane-dense (Bp, Vp), unmasked store. ---
    out_ref[...] = jnp.dot(h, w_fc_t, preferred_element_type=jnp.float32) + b_fc


def lstm_complex_forward(tokens, params):
    """tokens: (B, T) int32 -> logits (B, VOCAB_SIZE) float32."""
    B, T = tokens.shape
    H, V, E = HIDDEN_SIZE, VOCAB_SIZE, EMBEDDING_DIM
    Bp = ((B + 7) // 8) * 8          # pad batch to a full sublane group
    Vp = ((V + 127) // 128) * 128    # pad vocab to a full lane group

    # Layout plumbing only (no compute): time-major padded token ids + weight re-layout.
    tok_tb = jnp.transpose(tokens, (1, 0)).astype(jnp.int32)       # (T, B)
    tok_tb = jnp.pad(tok_tb, ((0, 0), (0, Bp - B)))                # pad rows use token 0;
    tok2d = tok_tb.reshape(T * Bp, 1)                              # padded batch rows are
                                                                   # sliced off below.
    emb_pad = jnp.pad(params['emb'], ((0, Vp - V), (0, 0)))        # (Vp, E)
    w_ih_t = params['w_ih'].T                                      # (E, 4H)
    w_hh_t = params['w_hh'].T                                      # (H, 4H)
    b = (params['b_ih'] + params['b_hh']).reshape(1, 4 * H)
    w_fc_t = jnp.pad(params['w_fc'].T, ((0, 0), (0, Vp - V)))      # (H, Vp)
    b_fc = jnp.pad(params['b_fc'], (0, Vp - V)).reshape(1, Vp)     # (1, Vp)

    vmem = pl.BlockSpec(memory_space=pltpu.MemorySpace.VMEM)
    out = pl.pallas_call(
        _lstm_fc_kernel,
        out_shape=jax.ShapeDtypeStruct((Bp, Vp), jnp.float32),
        in_specs=[vmem] * 7,
        out_specs=vmem,
    )(tok2d, emb_pad, w_ih_t, w_hh_t, b, w_fc_t, b_fc)
    # TODO(synk): for large B, add a grid over batch blocks with
    # dimension_semantics=("parallel",) so megacore / the second TensorCore is used.
    return out[:B, :V]


def ref_forward(tokens, params):
    """Pure-JAX reference matching PyTorch LSTM semantics."""
    H = HIDDEN_SIZE
    emb = params['emb'][tokens]                        # (B, T, E)
    B = emb.shape[0]

    def step(carry, x_t):
        h, c = carry
        g = (x_t @ params['w_ih'].T + params['b_ih']
             + h @ params['w_hh'].T + params['b_hh'])
        i_g = jax.nn.sigmoid(g[:, 0 * H:1 * H])
        f_g = jax.nn.sigmoid(g[:, 1 * H:2 * H])
        g_g = jnp.tanh(g[:, 2 * H:3 * H])
        o_g = jax.nn.sigmoid(g[:, 3 * H:4 * H])
        c_new = f_g * c + i_g * g_g
        h_new = o_g * jnp.tanh(c_new)
        return (h_new, c_new), None

    h0 = jnp.zeros((B, H), jnp.float32)
    c0 = jnp.zeros((B, H), jnp.float32)
    (h_last, _), _ = lax.scan(step, (h0, c0), jnp.transpose(emb, (1, 0, 2)))
    return h_last @ params['w_fc'].T + params['b_fc']


def make_params(key):
    H, V, E = HIDDEN_SIZE, VOCAB_SIZE, EMBEDDING_DIM
    ks = jax.random.split(key, 7)
    s = 0.1
    return {
        'emb':  jax.random.normal(ks[0], (V, E), jnp.float32),
        'w_ih': s * jax.random.normal(ks[1], (4 * H, E), jnp.float32),
        'w_hh': s * jax.random.normal(ks[2], (4 * H, H), jnp.float32),
        'b_ih': s * jax.random.normal(ks[3], (4 * H,), jnp.float32),
        'b_hh': s * jax.random.normal(ks[4], (4 * H,), jnp.float32),
        'w_fc': s * jax.random.normal(ks[5], (V, H), jnp.float32),
        'b_fc': s * jax.random.normal(ks[6], (V,), jnp.float32),
    }


if __name__ == "__main__":
    key = jax.random.PRNGKey(0)
    k_tok, k_par = jax.random.split(key)
    tokens = jax.random.randint(k_tok, (BATCH, SEQ_LEN), 0, VOCAB_SIZE, jnp.int32)
    params = make_params(k_par)

    logits = jax.jit(lstm_complex_forward)(tokens, params)
    jax.block_until_ready(logits)

    ref = ref_forward(tokens, params)
    assert logits.shape == (BATCH, VOCAB_SIZE)
    assert jnp.allclose(logits, ref, rtol=1e-3, atol=1e-3), "mismatch vs reference"
    print("KERNEL_OK")
</pallas_src>

<mosaic_0001>
module attributes {stable_mosaic.version = 11 : i64} {
  func.func @_lstm_fc_kernel(%arg0: memref<64x1xi32, #tpu.memory_space<vmem>>, %arg1: memref<128x64xf32, #tpu.memory_space<vmem>>, %arg2: memref<64x128xf32, #tpu.memory_space<vmem>>, %arg3: memref<32x128xf32, #tpu.memory_space<vmem>>, %arg4: memref<1x128xf32, #tpu.memory_space<vmem>>, %arg5: memref<32x128xf32, #tpu.memory_space<vmem>>, %arg6: memref<1x128xf32, #tpu.memory_space<vmem>>, %arg7: memref<8x128xf32, #tpu.memory_space<vmem>>) attributes {dimension_semantics = [], scalar_prefetch = 0 : i64, scratch_operands = 0 : i64, tpu.core_type = #tpu.core_type<tc>} {
    %c0 = arith.constant 0 : index
    %c0_0 = arith.constant 0 : index
    %0 = vector.load %arg3[%c0, %c0_0] : memref<32x128xf32, #tpu.memory_space<vmem>>, vector<32x128xf32>
    %c0_1 = arith.constant 0 : index
    %c0_2 = arith.constant 0 : index
    %1 = vector.load %arg5[%c0_1, %c0_2] : memref<32x128xf32, #tpu.memory_space<vmem>>, vector<32x128xf32>
    %c0_3 = arith.constant 0 : index
    %c0_4 = arith.constant 0 : index
    %2 = vector.load %arg6[%c0_3, %c0_4] : memref<1x128xf32, #tpu.memory_space<vmem>>, vector<1x128xf32>
    %c0_5 = arith.constant 0 : index
    %c0_6 = arith.constant 0 : index
    %3 = vector.load %arg0[%c0_5, %c0_6] : memref<64x1xi32, #tpu.memory_space<vmem>>, vector<64x1xi32>
    %4 = tpu.iota {dimensions = array<i32: 1>} : vector<64x128xi32>
    %5 = vector.broadcast %3 : vector<64x1xi32> to vector<64x128xi32>
    %6 = arith.cmpi eq, %5, %4 : vector<64x128xi32>
    %7 = arith.extui %6 : vector<64x128xi1> to vector<64x128xi32>
    %8 = arith.sitofp %7 : vector<64x128xi32> to vector<64x128xf32>
    %c0_7 = arith.constant 0 : index
    %c0_8 = arith.constant 0 : index
    %9 = vector.load %arg1[%c0_7, %c0_8] : memref<128x64xf32, #tpu.memory_space<vmem>>, vector<128x64xf32>
    %cst = arith.constant dense<0.000000e+00> : vector<64x64xf32>
    %10 = tpu.matmul %8, %9, %cst {dimension_numbers = #tpu.dot_dimension_numbers<[1], [0], [0], [1], [0, 0, 1, 1], [], []>} : vector<64x128xf32>, vector<128x64xf32>, vector<64x64xf32> -> vector<64x64xf32>
    %c0_9 = arith.constant 0 : index
    %c0_10 = arith.constant 0 : index
    %11 = vector.load %arg2[%c0_9, %c0_10] : memref<64x128xf32, #tpu.memory_space<vmem>>, vector<64x128xf32>
    %cst_11 = arith.constant dense<0.000000e+00> : vector<64x128xf32>
    %12 = tpu.matmul %10, %11, %cst_11 {dimension_numbers = #tpu.dot_dimension_numbers<[1], [0], [0], [1], [0, 0, 1, 1], [], []>} : vector<64x64xf32>, vector<64x128xf32>, vector<64x128xf32> -> vector<64x128xf32>
    %c0_12 = arith.constant 0 : index
    %c0_13 = arith.constant 0 : index
    %13 = vector.load %arg4[%c0_12, %c0_13] : memref<1x128xf32, #tpu.memory_space<vmem>>, vector<1x128xf32>
    %14 = vector.broadcast %13 : vector<1x128xf32> to vector<64x128xf32>
    %15 = arith.addf %12, %14 : vector<64x128xf32>
    %cst_14 = arith.constant 0.000000e+00 : f32
    %16 = vector.broadcast %cst_14 : f32 to vector<8x32xf32>
    %cst_15 = arith.constant 0.000000e+00 : f32
    %17 = vector.broadcast %cst_15 : f32 to vector<8x32xf32>
    %18 = vector.extract_strided_slice %15 {offsets = [0, 0], sizes = [8, 128], strides = [1, 1]} : vector<64x128xf32> to vector<8x128xf32>
    %cst_16 = arith.constant dense<0.000000e+00> : vector<8x128xf32>
    %19 = tpu.matmul %16, %0, %cst_16 {dimension_numbers = #tpu.dot_dimension_numbers<[1], [0], [0], [1], [0, 0, 1, 1], [], []>} : vector<8x32xf32>, vector<32x128xf32>, vector<8x128xf32> -> vector<8x128xf32>
    %20 = arith.addf %18, %19 : vector<8x128xf32>
    %21 = arith.negf %20 : vector<8x128xf32>
    %22 = math.exp %21 : vector<8x128xf32>
    %cst_17 = arith.constant 1.000000e+00 : f32
    %23 = vector.broadcast %cst_17 : f32 to vector<8x128xf32>
    %24 = arith.addf %23, %22 : vector<8x128xf32>
    %25 = arith.divf %23, %24 : vector<8x128xf32>
    %26 = math.tanh %20 : vector<8x128xf32>
    %27 = vector.extract_strided_slice %25 {offsets = [0, 0], sizes = [8, 32], strides = [1, 1]} : vector<8x128xf32> to vector<8x32xf32>
    %28 = vector.extract_strided_slice %25 {offsets = [0, 32], sizes = [8, 32], strides = [1, 1]} : vector<8x128xf32> to vector<8x32xf32>
    %29 = vector.extract_strided_slice %26 {offsets = [0, 64], sizes = [8, 32], strides = [1, 1]} : vector<8x128xf32> to vector<8x32xf32>
    %30 = vector.extract_strided_slice %25 {offsets = [0, 96], sizes = [8, 32], strides = [1, 1]} : vector<8x128xf32> to vector<8x32xf32>
    %31 = arith.mulf %28, %17 : vector<8x32xf32>
    %32 = arith.mulf %27, %29 : vector<8x32xf32>
    %33 = arith.addf %31, %32 : vector<8x32xf32>
    %34 = math.tanh %33 : vector<8x32xf32>
    %35 = arith.mulf %30, %34 : vector<8x32xf32>
    %36 = vector.extract_strided_slice %15 {offsets = [8, 0], sizes = [8, 128], strides = [1, 1]} : vector<64x128xf32> to vector<8x128xf32>
    %cst_18 = arith.constant dense<0.000000e+00> : vector<8x128xf32>
    %37 = tpu.matmul %35, %0, %cst_18 {dimension_numbers = #tpu.dot_dimension_numbers<[1], [0], [0], [1], [0, 0, 1, 1], [], []>} : vector<8x32xf32>, vector<32x128xf32>, vector<8x128xf32> -> vector<8x128xf32>
    %38 = arith.addf %36, %37 : vector<8x128xf32>
    %39 = arith.negf %38 : vector<8x128xf32>
    %40 = math.exp %39 : vector<8x128xf32>
    %cst_19 = arith.constant 1.000000e+00 : f32
    %41 = vector.broadcast %cst_19 : f32 to vector<8x128xf32>
    %42 = arith.addf %41, %40 : vector<8x128xf32>
    %43 = arith.divf %41, %42 : vector<8x128xf32>
    %44 = math.tanh %38 : vector<8x128xf32>
    %45 = vector.extract_strided_slice %43 {offsets = [0, 0], sizes = [8, 32], strides = [1, 1]} : vector<8x128xf32> to vector<8x32xf32>
    %46 = vector.extract_strided_slice %43 {offsets = [0, 32], sizes = [8, 32], strides = [1, 1]} : vector<8x128xf32> to vector<8x32xf32>
    %47 = vector.extract_strided_slice %44 {offsets = [0, 64], sizes = [8, 32], strides = [1, 1]} : vector<8x128xf32> to vector<8x32xf32>
    %48 = vector.extract_strided_slice %43 {offsets = [0, 96], sizes = [8, 32], strides = [1, 1]} : vector<8x128xf32> to vector<8x32xf32>
    %49 = arith.mulf %46, %33 : vector<8x32xf32>
    %50 = arith.mulf %45, %47 : vector<8x32xf32>
    %51 = arith.addf %49, %50 : vector<8x32xf32>
    %52 = math.tanh %51 : vector<8x32xf32>
    %53 = arith.mulf %48, %52 : vector<8x32xf32>
    %54 = vector.extract_strided_slice %15 {offsets = [16, 0], sizes = [8, 128], strides = [1, 1]} : vector<64x128xf32> to vector<8x128xf32>
    %cst_20 = arith.constant dense<0.000000e+00> : vector<8x128xf32>
    %55 = tpu.matmul %53, %0, %cst_20 {dimension_numbers = #tpu.dot_dimension_numbers<[1], [0], [0], [1], [0, 0, 1, 1], [], []>} : vector<8x32xf32>, vector<32x128xf32>, vector<8x128xf32> -> vector<8x128xf32>
    %56 = arith.addf %54, %55 : vector<8x128xf32>
    %57 = arith.negf %56 : vector<8x128xf32>
    %58 = math.exp %57 : vector<8x128xf32>
    %cst_21 = arith.constant 1.000000e+00 : f32
    %59 = vector.broadcast %cst_21 : f32 to vector<8x128xf32>
    %60 = arith.addf %59, %58 : vector<8x128xf32>
    %61 = arith.divf %59, %60 : vector<8x128xf32>
    %62 = math.tanh %56 : vector<8x128xf32>
    %63 = vector.extract_strided_slice %61 {offsets = [0, 0], sizes = [8, 32], strides = [1, 1]} : vector<8x128xf32> to vector<8x32xf32>
    %64 = vector.extract_strided_slice %61 {offsets = [0, 32], sizes = [8, 32], strides = [1, 1]} : vector<8x128xf32> to vector<8x32xf32>
    %65 = vector.extract_strided_slice %62 {offsets = [0, 64], sizes = [8, 32], strides = [1, 1]} : vector<8x128xf32> to vector<8x32xf32>
    %66 = vector.extract_strided_slice %61 {offsets = [0, 96], sizes = [8, 32], strides = [1, 1]} : vector<8x128xf32> to vector<8x32xf32>
    %67 = arith.mulf %64, %51 : vector<8x32xf32>
    %68 = arith.mulf %63, %65 : vector<8x32xf32>
    %69 = arith.addf %67, %68 : vector<8x32xf32>
    %70 = math.tanh %69 : vector<8x32xf32>
    %71 = arith.mulf %66, %70 : vector<8x32xf32>
    %72 = vector.extract_strided_slice %15 {offsets = [24, 0], sizes = [8, 128], strides = [1, 1]} : vector<64x128xf32> to vector<8x128xf32>
    %cst_22 = arith.constant dense<0.000000e+00> : vector<8x128xf32>
    %73 = tpu.matmul %71, %0, %cst_22 {dimension_numbers = #tpu.dot_dimension_numbers<[1], [0], [0], [1], [0, 0, 1, 1], [], []>} : vector<8x32xf32>, vector<32x128xf32>, vector<8x128xf32> -> vector<8x128xf32>
    %74 = arith.addf %72, %73 : vector<8x128xf32>
    %75 = arith.negf %74 : vector<8x128xf32>
    %76 = math.exp %75 : vector<8x128xf32>
    %cst_23 = arith.constant 1.000000e+00 : f32
    %77 = vector.broadcast %cst_23 : f32 to vector<8x128xf32>
    %78 = arith.addf %77, %76 : vector<8x128xf32>
    %79 = arith.divf %77, %78 : vector<8x128xf32>
    %80 = math.tanh %74 : vector<8x128xf32>
    %81 = vector.extract_strided_slice %79 {offsets = [0, 0], sizes = [8, 32], strides = [1, 1]} : vector<8x128xf32> to vector<8x32xf32>
    %82 = vector.extract_strided_slice %79 {offsets = [0, 32], sizes = [8, 32], strides = [1, 1]} : vector<8x128xf32> to vector<8x32xf32>
    %83 = vector.extract_strided_slice %80 {offsets = [0, 64], sizes = [8, 32], strides = [1, 1]} : vector<8x128xf32> to vector<8x32xf32>
    %84 = vector.extract_strided_slice %79 {offsets = [0, 96], sizes = [8, 32], strides = [1, 1]} : vector<8x128xf32> to vector<8x32xf32>
    %85 = arith.mulf %82, %69 : vector<8x32xf32>
    %86 = arith.mulf %81, %83 : vector<8x32xf32>
    %87 = arith.addf %85, %86 : vector<8x32xf32>
    %88 = math.tanh %87 : vector<8x32xf32>
    %89 = arith.mulf %84, %88 : vector<8x32xf32>
    %90 = vector.extract_strided_slice %15 {offsets = [32, 0], sizes = [8, 128], strides = [1, 1]} : vector<64x128xf32> to vector<8x128xf32>
    %cst_24 = arith.constant dense<0.000000e+00> : vector<8x128xf32>
    %91 = tpu.matmul %89, %0, %cst_24 {dimension_numbers = #tpu.dot_dimension_numbers<[1], [0], [0], [1], [0, 0, 1, 1], [], []>} : vector<8x32xf32>, vector<32x128xf32>, vector<8x128xf32> -> vector<8x128xf32>
    %92 = arith.addf %90, %91 : vector<8x128xf32>
    %93 = arith.negf %92 : vector<8x128xf32>
    %94 = math.exp %93 : vector<8x128xf32>
    %cst_25 = arith.constant 1.000000e+00 : f32
    %95 = vector.broadcast %cst_25 : f32 to vector<8x128xf32>
    %96 = arith.addf %95, %94 : vector<8x128xf32>
    %97 = arith.divf %95, %96 : vector<8x128xf32>
    %98 = math.tanh %92 : vector<8x128xf32>
    %99 = vector.extract_strided_slice %97 {offsets = [0, 0], sizes = [8, 32], strides = [1, 1]} : vector<8x128xf32> to vector<8x32xf32>
    %100 = vector.extract_strided_slice %97 {offsets = [0, 32], sizes = [8, 32], strides = [1, 1]} : vector<8x128xf32> to vector<8x32xf32>
    %101 = vector.extract_strided_slice %98 {offsets = [0, 64], sizes = [8, 32], strides = [1, 1]} : vector<8x128xf32> to vector<8x32xf32>
    %102 = vector.extract_strided_slice %97 {offsets = [0, 96], sizes = [8, 32], strides = [1, 1]} : vector<8x128xf32> to vector<8x32xf32>
    %103 = arith.mulf %100, %87 : vector<8x32xf32>
    %104 = arith.mulf %99, %101 : vector<8x32xf32>
    %105 = arith.addf %103, %104 : vector<8x32xf32>
    %106 = math.tanh %105 : vector<8x32xf32>
    %107 = arith.mulf %102, %106 : vector<8x32xf32>
    %108 = vector.extract_strided_slice %15 {offsets = [40, 0], sizes = [8, 128], strides = [1, 1]} : vector<64x128xf32> to vector<8x128xf32>
    %cst_26 = arith.constant dense<0.000000e+00> : vector<8x128xf32>
    %109 = tpu.matmul %107, %0, %cst_26 {dimension_numbers = #tpu.dot_dimension_numbers<[1], [0], [0], [1], [0, 0, 1, 1], [], []>} : vector<8x32xf32>, vector<32x128xf32>, vector<8x128xf32> -> vector<8x128xf32>
    %110 = arith.addf %108, %109 : vector<8x128xf32>
    %111 = arith.negf %110 : vector<8x128xf32>
    %112 = math.exp %111 : vector<8x128xf32>
    %cst_27 = arith.constant 1.000000e+00 : f32
    %113 = vector.broadcast %cst_27 : f32 to vector<8x128xf32>
    %114 = arith.addf %113, %112 : vector<8x128xf32>
    %115 = arith.divf %113, %114 : vector<8x128xf32>
    %116 = math.tanh %110 : vector<8x128xf32>
    %117 = vector.extract_strided_slice %115 {offsets = [0, 0], sizes = [8, 32], strides = [1, 1]} : vector<8x128xf32> to vector<8x32xf32>
    %118 = vector.extract_strided_slice %115 {offsets = [0, 32], sizes = [8, 32], strides = [1, 1]} : vector<8x128xf32> to vector<8x32xf32>
    %119 = vector.extract_strided_slice %116 {offsets = [0, 64], sizes = [8, 32], strides = [1, 1]} : vector<8x128xf32> to vector<8x32xf32>
    %120 = vector.extract_strided_slice %115 {offsets = [0, 96], sizes = [8, 32], strides = [1, 1]} : vector<8x128xf32> to vector<8x32xf32>
    %121 = arith.mulf %118, %105 : vector<8x32xf32>
    %122 = arith.mulf %117, %119 : vector<8x32xf32>
    %123 = arith.addf %121, %122 : vector<8x32xf32>
    %124 = math.tanh %123 : vector<8x32xf32>
    %125 = arith.mulf %120, %124 : vector<8x32xf32>
    %126 = vector.extract_strided_slice %15 {offsets = [48, 0], sizes = [8, 128], strides = [1, 1]} : vector<64x128xf32> to vector<8x128xf32>
    %cst_28 = arith.constant dense<0.000000e+00> : vector<8x128xf32>
    %127 = tpu.matmul %125, %0, %cst_28 {dimension_numbers = #tpu.dot_dimension_numbers<[1], [0], [0], [1], [0, 0, 1, 1], [], []>} : vector<8x32xf32>, vector<32x128xf32>, vector<8x128xf32> -> vector<8x128xf32>
    %128 = arith.addf %126, %127 : vector<8x128xf32>
    %129 = arith.negf %128 : vector<8x128xf32>
    %130 = math.exp %129 : vector<8x128xf32>
    %cst_29 = arith.constant 1.000000e+00 : f32
    %131 = vector.broadcast %cst_29 : f32 to vector<8x128xf32>
    %132 = arith.addf %131, %130 : vector<8x128xf32>
    %133 = arith.divf %131, %132 : vector<8x128xf32>
    %134 = math.tanh %128 : vector<8x128xf32>
    %135 = vector.extract_strided_slice %133 {offsets = [0, 0], sizes = [8, 32], strides = [1, 1]} : vector<8x128xf32> to vector<8x32xf32>
    %136 = vector.extract_strided_slice %133 {offsets = [0, 32], sizes = [8, 32], strides = [1, 1]} : vector<8x128xf32> to vector<8x32xf32>
    %137 = vector.extract_strided_slice %134 {offsets = [0, 64], sizes = [8, 32], strides = [1, 1]} : vector<8x128xf32> to vector<8x32xf32>
    %138 = vector.extract_strided_slice %133 {offsets = [0, 96], sizes = [8, 32], strides = [1, 1]} : vector<8x128xf32> to vector<8x32xf32>
    %139 = arith.mulf %136, %123 : vector<8x32xf32>
    %140 = arith.mulf %135, %137 : vector<8x32xf32>
    %141 = arith.addf %139, %140 : vector<8x32xf32>
    %142 = math.tanh %141 : vector<8x32xf32>
    %143 = arith.mulf %138, %142 : vector<8x32xf32>
    %144 = vector.extract_strided_slice %15 {offsets = [56, 0], sizes = [8, 128], strides = [1, 1]} : vector<64x128xf32> to vector<8x128xf32>
    %cst_30 = arith.constant dense<0.000000e+00> : vector<8x128xf32>
    %145 = tpu.matmul %143, %0, %cst_30 {dimension_numbers = #tpu.dot_dimension_numbers<[1], [0], [0], [1], [0, 0, 1, 1], [], []>} : vector<8x32xf32>, vector<32x128xf32>, vector<8x128xf32> -> vector<8x128xf32>
    %146 = arith.addf %144, %145 : vector<8x128xf32>
    %147 = arith.negf %146 : vector<8x128xf32>
    %148 = math.exp %147 : vector<8x128xf32>
    %cst_31 = arith.constant 1.000000e+00 : f32
    %149 = vector.broadcast %cst_31 : f32 to vector<8x128xf32>
    %150 = arith.addf %149, %148 : vector<8x128xf32>
    %151 = arith.divf %149, %150 : vector<8x128xf32>
    %152 = math.tanh %146 : vector<8x128xf32>
    %153 = vector.extract_strided_slice %151 {offsets = [0, 0], sizes = [8, 32], strides = [1, 1]} : vector<8x128xf32> to vector<8x32xf32>
    %154 = vector.extract_strided_slice %151 {offsets = [0, 32], sizes = [8, 32], strides = [1, 1]} : vector<8x128xf32> to vector<8x32xf32>
    %155 = vector.extract_strided_slice %152 {offsets = [0, 64], sizes = [8, 32], strides = [1, 1]} : vector<8x128xf32> to vector<8x32xf32>
    %156 = vector.extract_strided_slice %151 {offsets = [0, 96], sizes = [8, 32], strides = [1, 1]} : vector<8x128xf32> to vector<8x32xf32>
    %157 = arith.mulf %154, %141 : vector<8x32xf32>
    %158 = arith.mulf %153, %155 : vector<8x32xf32>
    %159 = arith.addf %157, %158 : vector<8x32xf32>
    %160 = math.tanh %159 : vector<8x32xf32>
    %161 = arith.mulf %156, %160 : vector<8x32xf32>
    %cst_32 = arith.constant dense<0.000000e+00> : vector<8x128xf32>
    %162 = tpu.matmul %161, %1, %cst_32 {dimension_numbers = #tpu.dot_dimension_numbers<[1], [0], [0], [1], [0, 0, 1, 1], [], []>} : vector<8x32xf32>, vector<32x128xf32>, vector<8x128xf32> -> vector<8x128xf32>
    %163 = vector.broadcast %2 : vector<1x128xf32> to vector<8x128xf32>
    %164 = arith.addf %162, %163 : vector<8x128xf32>
    %c0_33 = arith.constant 0 : index
    %c0_34 = arith.constant 0 : index
    %165 = vector.load %arg7[%c0_33, %c0_34] : memref<8x128xf32, #tpu.memory_space<vmem>>, vector<8x128xf32>
    tpu.vector_store %arg7[%c0_33, %c0_34], %164 {strides = array<i32>} : memref<8x128xf32, #tpu.memory_space<vmem>>, vector<8x128xf32>,
    return
  }
}

</mosaic_0001>

<bundles_post_ra>
// kernel: lstm_complex_forward.1
= control target key start
LH: loop header
LB: loop body
LE: loop exit
PB: predicated region body
PF: predicated region fallthrough
CT: control target
= control target key end

     0   :  { %v1717_v0 = vmov 0   ;;  %v43_v45 = vlaneseq  ;;  %v1718_v49 = vmov 1.0   ;;  %v1719_v56 = vmov 0.0|0.0   ;;  %s1723_s24 = smov 32   ;;  %s2016_s0 = inlined_call_operand.vmem [shape: s32[64,1], index: 0, kind: input, shape index: {}]   ;;  %s2017_s1 = inlined_call_operand.vmem [shape: f32[128,64], index: 1, kind: input, shape index: {}]   ;;  %s2018_s2 = inlined_call_operand.vmem [shape: f32[64,128], index: 2, kind: input, shape index: {}]   ;;  %s2019_s3 = inlined_call_operand.vmem [shape: f32[32,128], index: 3, kind: input, shape index: {}]   ;;  %s2020_s4 = inlined_call_operand.vmem [shape: f32[1,128], index: 4, kind: input, shape index: {}]   ;;  %s2021_s5 = inlined_call_operand.vmem [shape: f32[32,128], index: 5, kind: input, shape index: {}]   ;;  %s2022_s6 = inlined_call_operand.vmem [shape: f32[1,128], index: 6, kind: input, shape index: {}]   ;;  %s2023_s7 = inlined_call_operand.vmem [shape: f32[8,128], index: 7, kind: output, shape index: {}]  }
   0x1   :  { %1652 = vset.pattern.permute.xlu1 %v1717_v0  ;;  %1651 = vset.pattern.permute.xlu0 %v1717_v0  ;;  %v37_v1 = vld [vmem:[%s2016_s0 + $0x10] sm:$0xff]  ;;  %v35_v2 = vld [vmem:[%s2016_s0] sm:$0xff]  ;;  %v38_v3 = vld [vmem:[%s2016_s0 + $0x18] sm:$0xff]  ;;  %vm1720_vm8 = vmmov 0   ;;  %v1721_v63 = vmov 0.0   ;;  %vm229_vm9 = vcmask 523264  }
   0x2   :  { %52 = vperm.xlu1 %1652, %v37_v1   ;;  %46 = vperm.xlu0 %1651, %v35_v2   ;;  %v36_v4 = vld [vmem:[%s2016_s0 + $0x8] sm:$0xff]  ;;  %v93_v5 = vld [vmem:[%s2017_s1] sm:$0xff]  ;;  %v95_v7 = vld [vmem:[%s2017_s1 + $0x10] sm:$0xff]  ;;  %v44_v46 = vand.u32 127, %v43_v45  ;;  %vm359_vm10 = vcmask 261120  }
   0x3   :  { %v94_v6 = vld [vmem:[%s2017_s1 + $0x8] sm:$0xff]  ;;  %v96_v8 = vld [vmem:[%s2017_s1 + $0x18] sm:$0xff]  ;;  %v97_v11 = vld [vmem:[%s2017_s1 + $0x20] sm:$0xff] }
   0x4   :  { %v1542_v9 = vpack.c.bf16 %v94_v6, %v93_v5  ;;  %v1546_v10 = vpack.c.bf16 %v96_v8, %v95_v7  ;;  %v98_v12 = vld [vmem:[%s2017_s1 + $0x28] sm:$0xff]  ;;  %v39_v14 = vld [vmem:[%s2016_s0 + $0x20] sm:$0xff]  ;;  %v99_v16 = vld [vmem:[%s2017_s1 + $0x30] sm:$0xff] }
   0x5   :  { %v40_v13 = vld [vmem:[%s2016_s0 + $0x28] sm:$0xff]  ;;  %v1550_v15 = vpack.c.bf16 %v98_v12, %v97_v11  ;;  %v100_v17 = vld [vmem:[%s2017_s1 + $0x38] sm:$0xff]  ;;  %v41_v19 = vld [vmem:[%s2016_s0 + $0x30] sm:$0xff] }
   0x6   :  { %55 = vperm.xlu1 %1652, %v38_v3   ;;  %49 = vperm.xlu0 %1651, %v36_v4   ;;  %v42_v18 = vld [vmem:[%s2016_s0 + $0x38] sm:$0xff]  ;;  %v1554_v20 = vpack.c.bf16 %v100_v17, %v99_v16  ;;  %v101_v21 = vld [vmem:[%s2017_s1 + $0x40] sm:$0xff]  ;;  %v102_v22 = vld [vmem:[%s2017_s1 + $0x48] sm:$0xff] }
   0x7   :  { %1543 = vmatprep.subr.bf16.mxu0 %v1542_v9  ;;  %v1558_v23 = vpack.c.bf16 %v102_v22, %v101_v21  ;;  %v103_v24 = vld [vmem:[%s2017_s1 + $0x50] sm:$0xff]  ;;  %v104_v25 = vld [vmem:[%s2017_s1 + $0x58] sm:$0xff]  ;;  %v214_v26 = vld [vmem:[%s2018_s2] sm:$0xff] }
   0x8   :  { %1545 = vmatpush3.bf16.msra.mxu0 %v1542_v9  ;;  %v215_v27 = vld [vmem:[%s2018_s2 + $0x8] sm:$0xff]  ;;  %v216_v28 = vld [vmem:[%s2018_s2 + $0x10] sm:$0xff]  ;;  %v1562_v29 = vpack.c.bf16 %v104_v25, %v103_v24  ;;  %v105_v30 = vld [vmem:[%s2017_s1 + $0x60] sm:$0xff] }
   0x9   :  { %1547 = vmatprep.subr.bf16.mxu0 %v1546_v10  ;;  %v1574_v31 = vpack.c.bf16 %v215_v27, %v214_v26  ;;  %v217_v32 = vld [vmem:[%s2018_s2 + $0x18] sm:$0xff]  ;;  %v106_v33 = vld [vmem:[%s2017_s1 + $0x68] sm:$0xff]  ;;  %v218_v35 = vld [vmem:[%s2018_s2 + $0x20] sm:$0xff] }
   0xa   :  { %61 = vperm.xlu1 %1652, %v40_v13   ;;  %58 = vperm.xlu0 %1651, %v39_v14   ;;  %v1578_v34 = vpack.c.bf16 %v217_v32, %v216_v28  ;;  %v219_v36 = vld [vmem:[%s2018_s2 + $0x28] sm:$0xff]  ;;  %v1566_v37 = vpack.c.bf16 %v106_v33, %v105_v30  ;;  %v107_v38 = vld [vmem:[%s2017_s1 + $0x70] sm:$0xff]  ;;  %v108_v40 = vld [vmem:[%s2017_s1 + $0x78] sm:$0xff] }
   0xb   :  { %1575 = vmatprep.subr.bf16.mxu1 %v1574_v31  ;;  %v1582_v39 = vpack.c.bf16 %v219_v36, %v218_v35  ;;  %v220_v41 = vld [vmem:[%s2018_s2 + $0x30] sm:$0xff]  ;;  %v221_v42 = vld [vmem:[%s2018_s2 + $0x38] sm:$0xff]  ;;  %v1570_v43 = vpack.c.bf16 %v108_v40, %v107_v38  ;;  %v26_v57 = vld [vmem:[%s2019_s3] sm:$0xff] }
   0xc   :  { %1549 = vmatpush3.bf16.msra.mxu0 %v1546_v10  ;;  %1577 = vmatpush3.bf16.msra.mxu1 %v1574_v31  ;;  %v1586_v44 = vpack.c.bf16 %v221_v42, %v220_v41  ;;  %v27_v58 = vld [vmem:[%s2019_s3 + $0x8] sm:$0xff]  ;;  %v28_v60 = vld [vmem:[%s2019_s3 + $0x10] sm:$0xff]  ;;  %v29_v61 = vld [vmem:[%s2019_s3 + $0x18] sm:$0xff] }
   0xd   :  { %1551 = vmatprep.subr.bf16.mxu0 %v1550_v15  ;;  %1579 = vmatprep.subr.bf16.mxu1 %v1578_v34  ;;  %v1868_v59 = vpack.c.bf16 %v27_v58, %v26_v57  ;;  %v1878_v62 = vpack.c.bf16 %v29_v61, %v28_v60  ;;  %v1260_v8 = vld [vmem:[%s2020_s4] ss:$0 sm:$0xff]  ;;  %s1722_s4 = smov 64  }
   0xe   :  { %67 = vperm.xlu1 %1652, %v42_v18   ;;  %64 = vperm.xlu0 %1651, %v41_v19  }
  0x10   :  { %1553 = vmatpush3.bf16.msra.mxu0 %v1550_v15  ;;  %1581 = vmatpush3.bf16.msra.mxu1 %v1578_v34 }
  0x11   :  { %1555 = vmatprep.subr.bf16.mxu0 %v1554_v20  ;;  %1583 = vmatprep.subr.bf16.mxu1 %v1582_v39 }
  0x14   :  { %1557 = vmatpush3.bf16.msra.mxu0 %v1554_v20  ;;  %1585 = vmatpush3.bf16.msra.mxu1 %v1582_v39 }
  0x15   :  { %1559 = vmatprep.subr.bf16.mxu0 %v1558_v23  ;;  %1587 = vmatprep.subr.bf16.mxu1 %v1586_v44 }
  0x18   :  { %1561 = vmatpush3.bf16.msra.mxu0 %v1558_v23  ;;  %1589 = vmatpush3.bf16.msra.mxu1 %v1586_v44 }
  0x19   :  { %1563 = vmatprep.subr.bf16.mxu0 %v1562_v29  ;;  %1590 = vmatprep.subr.bf16.mxu1 %v1719_v56 }
  0x1c   :  { %1565 = vmatpush3.bf16.msra.mxu0 %v1562_v29 }
  0x1d   :  { %1567 = vmatprep.subr.bf16.mxu0 %v1566_v37 }
  0x20   :  { %1569 = vmatpush3.bf16.msra.mxu0 %v1566_v37 }
  0x21   :  { %1571 = vmatprep.subr.bf16.mxu0 %v1570_v43 }
  0x24   :  { %1573 = vmatpush3.bf16.msra.mxu0 %v1570_v43 }
  0x25   :  { %1602 = vmatprep.subr.bf16.mxu0 %v1719_v56 }
  0x81   :  { %v53_v47 = vpop.permute.xlu1 %52  ;;  %v47_v48 = vpop.permute.xlu0 %46 }
  0x82   :  { %vm69_vm0 = vcmp.eq.s32.totalorder %v47_v48, %v44_v46  ;;  %vm71_vm1 = vcmp.eq.s32.totalorder %v53_v47, %v44_v46 }
  0x83   :  { %1403 = vmatprep.mubr.msk.f32.mxu0 %vm69_vm0, %v1718_v49 }
  0x85   :  { %v56_v50 = vpop.permute.xlu1 %55  ;;  %v50_v51 = vpop.permute.xlu0 %49 }
  0x86   :  { %vm70_vm2 = vcmp.eq.s32.totalorder %v50_v51, %v44_v46  ;;  %vm72_vm3 = vcmp.eq.s32.totalorder %v56_v50, %v44_v46 }
  0x87   :  { %1404 = vmatmul.mubr.msk.f32.vlgmr.msra.gmra.mrb[0].mxu0 %vm70_vm2, %v1718_v49 }
  0x88   :  { %1406 = vmatprep.mubr.msk.f32.mxu0 %vm71_vm1, %v1718_v49  ;;  %1604 = vmatpush3.bf16.msra.mxu0 %v1868_v59 }
  0x89   :  { %v62_v52 = vpop.permute.xlu1 %61  ;;  %v59_v53 = vpop.permute.xlu0 %58  ;;  %1605 = vmatprep.subr.bf16.mxu0 %v1719_v56 }
  0x8a   :  { %vm73_vm4 = vcmp.eq.s32.totalorder %v59_v53, %v44_v46  ;;  %vm74_vm5 = vcmp.eq.s32.totalorder %v62_v52, %v44_v46 }
  0x8b   :  { %1407 = vmatmul.mubr.msk.f32.gmra.mrb[2].mxu0 %vm72_vm3, %v1718_v49 }
  0x8c   :  { %1409 = vmatprep.mubr.msk.f32.mxu0 %vm73_vm4, %v1718_v49  ;;  %1607 = vmatpush3.bf16.msra.mxu0 %v1878_v62 }
  0x8d   :  { %v65_v54 = vpop.permute.xlu0 %64  ;;  %v68_v55 = vpop.permute.xlu1 %67  ;;  %1614 = vmatprep.subr.bf16.mxu0 %v1719_v56 }
  0x8e   :  { %vm75_vm6 = vcmp.eq.s32.totalorder %v65_v54, %v44_v46  ;;  %vm76_vm7 = vcmp.eq.s32.totalorder %v68_v55, %v44_v46 }
  0x8f   :  { %1410 = vmatmul.mubr.msk.f32.gmra.mrb[4].mxu0 %vm74_vm5, %v1718_v49 }
  0x90   :  { %1412 = vmatprep.mubr.msk.f32.mxu0 %vm75_vm6, %v1718_v49 }
  0x93   :  { %1413 = vmatmul.mubr.msk.f32.gmra.mrb[6].mxu0 %vm76_vm7, %v1718_v49 }
  0x94   :  { %1473 = vmatprep.mubr.msk.f32.mxu0 %vm1720_vm8, %v1721_v63 }
 0x15a   :  { %v1405_v0 = vpop.f32.mrb[0].mxu0 }
 0x15b   :  { %v175_v1 = vpop.f32.mrb[1].mxu0 }
 0x15c   :  { %1431 = vmatprep.mubr.msk.f32.mxu1 %vm229_vm9, %v175_v1 }
 0x15d   :  { %1432 = vmatmul.mubr.msk.f32.vlgmr.msra.gmra.mrb[0].mxu1 %vm229_vm9, %v1405_v0 }
 0x15e   :  { %1592 = vmatpush3.bf16.msra.mxu1 %v1868_v59  ;;  %v1408_v2 = vpop.f32.mrb[2].mxu0 }
 0x15f   :  { %v185_v3 = vpop.f32.mrb[3].mxu0  ;;  %1593 = vmatprep.subr.bf16.mxu1 %v1719_v56 }
 0x160   :  { %1434 = vmatprep.mubr.msk.f32.mxu1 %vm229_vm9, %v185_v3 }
 0x161   :  { %1435 = vmatmul.mubr.msk.f32.gmra.mrb[2].mxu1 %vm229_vm9, %v1408_v2 }
 0x162   :  { %v1411_v4 = vpop.f32.mrb[4].mxu0  ;;  %1595 = vmatpush3.bf16.msra.mxu1 %v1878_v62 }
 0x163   :  { %v195_v5 = vpop.f32.mrb[5].mxu0  ;;  %1596 = vmatprep.subr.bf16.mxu1 %v1719_v56 }
 0x164   :  { %1437 = vmatprep.mubr.msk.f32.mxu1 %vm229_vm9, %v195_v5 }
 0x165   :  { %1438 = vmatmul.mubr.msk.f32.gmra.mrb[4].mxu1 %vm229_vm9, %v1411_v4 }
 0x166   :  { %v1414_v6 = vpop.f32.mrb[6].mxu0 }
 0x167   :  { %v205_v7 = vpop.f32.mrb[7].mxu0 }
 0x168   :  { %1440 = vmatprep.mubr.msk.f32.mxu1 %vm229_vm9, %v205_v7 }
 0x169   :  { %1441 = vmatmul.mubr.msk.f32.gmra.mrb[6].mxu1 %vm229_vm9, %v1414_v6 }
 0x16a   :  { %1451 = vmatprep.mubr.msk.f32.mxu1 %vm1720_vm8, %v1721_v63 }
 0x16d   :  { %1452 = vmatmul.mubr.f32.vlgmr.msra.gmra.mrb[8].mxu1 %v1721_v63 }
 0x16e   :  { %1598 = vmatpush3.bf16.msra.mxu1 %v1868_v59  ;;  %1462 = vmatprep.mubr.msk.f32.mxu1 %vm1720_vm8, %v1721_v63 }
 0x16f   :  { %1599 = vmatprep.subr.bf16.mxu1 %v1719_v56 }
 0x172   :  { %1601 = vmatpush3.bf16.msra.mxu1 %v1878_v62 }
 0x173   :  { %1608 = vmatprep.subr.bf16.mxu1 %v1719_v56 }
 0x230   :  { %v1433_v9 = vpop.f32.mrb[0].mxu1 }
 0x231   :  { %v326_v10 = vadd.f32 %v1433_v9, %v1260_v8  ;;  %v320_v11 = vpop.f32.mrb[1].mxu1 }
 0x232   :  { %v321_v24 = vadd.f32 %v1260_v8, %v320_v11 }
 0x234   :  { %v1436_v12 = vpop.f32.mrb[2].mxu1 }
 0x235   :  { %v1908_v13 = vadd.f32 %v1436_v12, %v1260_v8  ;;  %v330_v14 = vpop.f32.mrb[3].mxu1 }
 0x236   :  { %v1910_v15 = vadd.f32 %v1260_v8, %v330_v14 }
 0x238   :  { %v1439_v16 = vpop.f32.mrb[4].mxu1 }
 0x239   :  { %v1912_v17 = vadd.f32 %v1439_v16, %v1260_v8  ;;  %v340_v18 = vpop.f32.mrb[5].mxu1 }
 0x23a   :  { %v1914_v19 = vadd.f32 %v1260_v8, %v340_v18 }
 0x23c   :  { %v1442_v20 = vpop.f32.mrb[6].mxu1 }
 0x23d   :  { %v1916_v21 = vadd.f32 %v1442_v20, %v1260_v8  ;;  %v350_v22 = vpop.f32.mrb[7].mxu1 }
 0x23e   :  { %v1918_v23 = vadd.f32 %v1260_v8, %v350_v22 }
 0x240   :  { %v429_v25 = vpop.f32.mrb[8].mxu1 }
 0x241   :  { %v433_v26 = vadd.f32 %v429_v25, %v321_v24  ;;  %v1453_v27 = vpop.f32.mrb[9].mxu1 }
 0x243   :  { %1653 = vtanh.f32 %v433_v26  ;;  %v1269_v29 = vmul.f32 -1.442695, %v433_v26 }
 0x245   :  { %1655 = vpow2.f32 %v1269_v29 }
 0x24d   :  { %v1654_v28 = vpop.eup %1653 }
 0x24e   :  { %443 = vrot.lane.b32.xlu0 %v1654_v28, %s1722_s4 }
 0x24f   :  { %v1656_v30 = vpop.eup %1655 }
 0x250   :  { %v437_v31 = vadd.f32 1.0, %v1656_v30 }
 0x252   :  { %1657 = vrcp.f32 %v437_v31 }
 0x25c   :  { %v1658_v32 = vpop.eup %1657 }
 0x25d   :  { %v441_v35 = vmul.f32 0.0, %v1658_v32 }
 0x2c0   :  { %v444_v33 = vpop.permute.xlu0 %443 }
 0x2c1   :  { %v446_v34 = vmul.f32 %v1658_v32, %v444_v33 }
 0x2c3   :  { %448 = vrot.lane.b32.xlu1 %v446_v34, %s1723_s24 }
 0x335   :  { %v449_v36 = vpop.permute.xlu1 %448 }
 0x336   :  { %v451_v37 = vadd.f32 %v449_v36, %v441_v35 }
 0x338   :  { %1659 = vtanh.f32 %v451_v37 }
 0x342   :  { %v1660_v38 = vpop.eup %1659 }
 0x343   :  { %454 = vrot.lane.b32.xlu0 %v1660_v38, %s1722_s4 }
 0x3b5   :  { %v455_v39 = vpop.permute.xlu0 %454 }
 0x3b6   :  { %v457_v40 = vmul.f32 %v1658_v32, %v455_v39 }
 0x3b8   :  { %459 = vrot.lane.b32.xlu1 %v457_v40, %s1723_s24 }
 0x42a   :  { %v460_v41 = vpop.permute.xlu1 %459 }
 0x42b   :  { %1463 = vmatmul.mubr.msk.f32.vlgmr.msra.gmra.mrb[10].mxu1 %vm359_vm10, %v460_v41 }
 0x42c   :  { %1610 = vmatpush3.bf16.msra.mxu1 %v1868_v59  ;;  %1484 = vmatprep.mubr.msk.f32.mxu1 %vm1720_vm8, %v1721_v63 }
 0x42d   :  { %1611 = vmatprep.subr.bf16.mxu1 %v1719_v56 }
 0x430   :  { %1613 = vmatpush3.bf16.msra.mxu1 %v1878_v62 }
 0x431   :  { %1620 = vmatprep.subr.bf16.mxu1 %v1719_v56 }
 0x4fe   :  { %v529_v42 = vpop.f32.mrb[10].mxu1 }
 0x4ff   :  { %v533_v43 = vadd.f32 %v529_v42, %v326_v10  ;;  %v1464_v44 = vpop.f32.mrb[11].mxu1 }
 0x501   :  { %1661 = vtanh.f32 %v533_v43  ;;  %v1271_v46 = vmul.f32 -1.442695, %v533_v43 }
 0x503   :  { %1663 = vpow2.f32 %v1271_v46 }
 0x50b   :  { %v1662_v45 = vpop.eup %1661 }
 0x50c   :  { %543 = vrot.lane.b32.xlu0 %v1662_v45, %s1722_s4 }
 0x50d   :  { %v1664_v47 = vpop.eup %1663 }
 0x50e   :  { %v537_v48 = vadd.f32 1.0, %v1664_v47 }
 0x510   :  { %1665 = vrcp.f32 %v537_v48 }
 0x51a   :  { %v1666_v49 = vpop.eup %1665 }
 0x51b   :  { %v541_v52 = vmul.f32 %v1666_v49, %v451_v37 }
 0x57e   :  { %v544_v50 = vpop.permute.xlu0 %543 }
 0x57f   :  { %v546_v51 = vmul.f32 %v1666_v49, %v544_v50 }
 0x581   :  { %548 = vrot.lane.b32.xlu1 %v546_v51, %s1723_s24 }
 0x5f3   :  { %v549_v53 = vpop.permute.xlu1 %548 }
 0x5f4   :  { %v551_v54 = vadd.f32 %v549_v53, %v541_v52 }
 0x5f6   :  { %1667 = vtanh.f32 %v551_v54 }
 0x600   :  { %v1668_v55 = vpop.eup %1667 }
 0x601   :  { %554 = vrot.lane.b32.xlu0 %v1668_v55, %s1722_s4 }
 0x673   :  { %v555_v57 = vpop.permute.xlu0 %554 }
 0x674   :  { %v557_v58 = vmul.f32 %v1666_v49, %v555_v57 }
 0x676   :  { %559 = vrot.lane.b32.xlu1 %v557_v58, %s1723_s24 }
 0x6e8   :  { %v560_v60 = vpop.permute.xlu1 %559 }
 0x6e9   :  { %1474 = vmatmul.mubr.msk.f32.vlgmr.msra.gmra.mrb[8].mxu0 %vm359_vm10, %v560_v60 }
 0x6ea   :  { %1616 = vmatpush3.bf16.msra.mxu0 %v1868_v59  ;;  %1495 = vmatprep.mubr.msk.f32.mxu0 %vm1720_vm8, %v1721_v63 }
 0x6eb   :  { %1617 = vmatprep.subr.bf16.mxu0 %v1719_v56 }
 0x6ee   :  { %1619 = vmatpush3.bf16.msra.mxu0 %v1878_v62 }
 0x6ef   :  { %1626 = vmatprep.subr.bf16.mxu0 %v1719_v56 }
 0x7bc   :  { %v629_v61 = vpop.f32.mrb[8].mxu0 }
 0x7bd   :  { %v633_v0 = vadd.f32 %v629_v61, %v1910_v15  ;;  %v1475_v1 = vpop.f32.mrb[9].mxu0 }
 0x7bf   :  { %1669 = vtanh.f32 %v633_v0  ;;  %v1273_v3 = vmul.f32 -1.442695, %v633_v0 }
 0x7c1   :  { %1671 = vpow2.f32 %v1273_v3 }
 0x7c9   :  { %v1670_v2 = vpop.eup %1669 }
 0x7ca   :  { %643 = vrot.lane.b32.xlu0 %v1670_v2, %s1722_s4 }
 0x7cb   :  { %v1672_v4 = vpop.eup %1671 }
 0x7cc   :  { %v637_v5 = vadd.f32 1.0, %v1672_v4 }
 0x7ce   :  { %1673 = vrcp.f32 %v637_v5 }
 0x7d8   :  { %v1674_v6 = vpop.eup %1673 }
 0x7d9   :  { %v641_v9 = vmul.f32 %v1674_v6, %v551_v54 }
 0x83c   :  { %v644_v7 = vpop.permute.xlu0 %643 }
 0x83d   :  { %v646_v8 = vmul.f32 %v1674_v6, %v644_v7 }
 0x83f   :  { %648 = vrot.lane.b32.xlu1 %v646_v8, %s1723_s24 }
 0x8b1   :  { %v649_v10 = vpop.permute.xlu1 %648 }
 0x8b2   :  { %v651_v11 = vadd.f32 %v649_v10, %v641_v9 }
 0x8b4   :  { %1675 = vtanh.f32 %v651_v11 }
 0x8be   :  { %v1676_v12 = vpop.eup %1675 }
 0x8bf   :  { %654 = vrot.lane.b32.xlu0 %v1676_v12, %s1722_s4 }
 0x931   :  { %v655_v14 = vpop.permute.xlu0 %654 }
 0x932   :  { %v657_v15 = vmul.f32 %v1674_v6, %v655_v14 }
 0x934   :  { %659 = vrot.lane.b32.xlu1 %v657_v15, %s1723_s24 }
 0x9a6   :  { %v660_v16 = vpop.permute.xlu1 %659 }
 0x9a7   :  { %1485 = vmatmul.mubr.msk.f32.vlgmr.msra.gmra.mrb[12].mxu1 %vm359_vm10, %v660_v16 }
 0x9a8   :  { %1622 = vmatpush3.bf16.msra.mxu1 %v1868_v59  ;;  %1506 = vmatprep.mubr.msk.f32.mxu1 %vm1720_vm8, %v1721_v63 }
 0x9a9   :  { %1623 = vmatprep.subr.bf16.mxu1 %v1719_v56 }
 0x9ac   :  { %1625 = vmatpush3.bf16.msra.mxu1 %v1878_v62 }
 0x9ad   :  { %1632 = vmatprep.subr.bf16.mxu1 %v1719_v56 }
 0xa7a   :  { %v729_v18 = vpop.f32.mrb[12].mxu1 }
 0xa7b   :  { %v733_v20 = vadd.f32 %v729_v18, %v1908_v13  ;;  %v1486_v22 = vpop.f32.mrb[13].mxu1 }
 0xa7d   :  { %1677 = vtanh.f32 %v733_v20  ;;  %v1275_v25 = vmul.f32 -1.442695, %v733_v20 }
 0xa7f   :  { %1679 = vpow2.f32 %v1275_v25 }
 0xa87   :  { %v1678_v24 = vpop.eup %1677 }
 0xa88   :  { %743 = vrot.lane.b32.xlu0 %v1678_v24, %s1722_s4 }
 0xa89   :  { %v1680_v26 = vpop.eup %1679 }
 0xa8a   :  { %v737_v27 = vadd.f32 1.0, %v1680_v26 }
 0xa8c   :  { %1681 = vrcp.f32 %v737_v27 }
 0xa96   :  { %v1682_v28 = vpop.eup %1681 }
 0xa97   :  { %v741_v31 = vmul.f32 %v1682_v28, %v651_v11 }
 0xafa   :  { %v744_v29 = vpop.permute.xlu0 %743 }
 0xafb   :  { %v746_v30 = vmul.f32 %v1682_v28, %v744_v29 }
 0xafd   :  { %748 = vrot.lane.b32.xlu1 %v746_v30, %s1723_s24 }
 0xb6f   :  { %v749_v32 = vpop.permute.xlu1 %748 }
 0xb70   :  { %v751_v33 = vadd.f32 %v749_v32, %v741_v31 }
 0xb72   :  { %1683 = vtanh.f32 %v751_v33 }
 0xb7c   :  { %v1684_v13 = vpop.eup %1683 }
 0xb7d   :  { %754 = vrot.lane.b32.xlu0 %v1684_v13, %s1722_s4 }
 0xbef   :  { %v755_v34 = vpop.permute.xlu0 %754 }
 0xbf0   :  { %v757_v35 = vmul.f32 %v1682_v28, %v755_v34 }
 0xbf2   :  { %759 = vrot.lane.b32.xlu1 %v757_v35, %s1723_s24 }
 0xc64   :  { %v760_v36 = vpop.permute.xlu1 %759 }
 0xc65   :  { %1496 = vmatmul.mubr.msk.f32.vlgmr.msra.gmra.mrb[10].mxu0 %vm359_vm10, %v760_v36 }
 0xc66   :  { %1628 = vmatpush3.bf16.msra.mxu0 %v1868_v59  ;;  %1517 = vmatprep.mubr.msk.f32.mxu0 %vm1720_vm8, %v1721_v63 }
 0xc67   :  { %1629 = vmatprep.subr.bf16.mxu0 %v1719_v56 }
 0xc6a   :  { %1631 = vmatpush3.bf16.msra.mxu0 %v1878_v62 }
 0xc6b   :  { %1638 = vmatprep.subr.bf16.mxu0 %v1719_v56 }
 0xd38   :  { %v829_v37 = vpop.f32.mrb[10].mxu0 }
 0xd39   :  { %v833_v38 = vadd.f32 %v829_v37, %v1914_v19  ;;  %v1497_v39 = vpop.f32.mrb[11].mxu0 }
 0xd3a   :  { %v31_v39 = vld [vmem:[%s2021_s5 + $0x8] sm:$0xff] }
 0xd3b   :  { %1685 = vtanh.f32 %v833_v38  ;;  %v1277_v41 = vmul.f32 -1.442695, %v833_v38 }
 0xd3d   :  { %1687 = vpow2.f32 %v1277_v41 }
 0xd45   :  { %v1686_v40 = vpop.eup %1685 }
 0xd46   :  { %843 = vrot.lane.b32.xlu0 %v1686_v40, %s1722_s4  ;;  %v32_v40 = vld [vmem:[%s2021_s5 + $0x10] sm:$0xff] }
 0xd47   :  { %v1688_v42 = vpop.eup %1687 }
 0xd48   :  { %v837_v43 = vadd.f32 1.0, %v1688_v42  ;;  %v33_v42 = vld [vmem:[%s2021_s5 + $0x18] sm:$0xff] }
 0xd4a   :  { %1689 = vrcp.f32 %v837_v43  ;;  %v1642_v43 = vpack.c.bf16 %v33_v42, %v32_v40 }
 0xd54   :  { %v1690_v44 = vpop.eup %1689 }
 0xd55   :  { %v841_v47 = vmul.f32 %v1690_v44, %v751_v33 }
 0xdb8   :  { %v844_v45 = vpop.permute.xlu0 %843 }
 0xdb9   :  { %v846_v46 = vmul.f32 %v1690_v44, %v844_v45 }
 0xdbb   :  { %848 = vrot.lane.b32.xlu1 %v846_v46, %s1723_s24 }
 0xe2d   :  { %v849_v48 = vpop.permute.xlu1 %848 }
 0xe2e   :  { %v851_v49 = vadd.f32 %v849_v48, %v841_v47  ;;  %v1284_v48 = vld [vmem:[%s2022_s6] ss:$0 sm:$0xff] }
 0xe30   :  { %1691 = vtanh.f32 %v851_v49 }
 0xe3a   :  { %v1692_v19 = vpop.eup %1691 }
 0xe3b   :  { %854 = vrot.lane.b32.xlu0 %v1692_v19, %s1722_s4 }
 0xead   :  { %v855_v50 = vpop.permute.xlu0 %854 }
 0xeae   :  { %v857_v51 = vmul.f32 %v1690_v44, %v855_v50 }
 0xeb0   :  { %859 = vrot.lane.b32.xlu1 %v857_v51, %s1723_s24 }
 0xf22   :  { %v860_v52 = vpop.permute.xlu1 %859 }
 0xf23   :  { %1507 = vmatmul.mubr.msk.f32.vlgmr.msra.gmra.mrb[14].mxu1 %vm359_vm10, %v860_v52 }
 0xf24   :  { %1634 = vmatpush3.bf16.msra.mxu1 %v1868_v59  ;;  %1528 = vmatprep.mubr.msk.f32.mxu1 %vm1720_vm8, %v1721_v63 }
 0xf25   :  { %1635 = vmatprep.subr.bf16.mxu1 %v1719_v56 }
 0xf28   :  { %1637 = vmatpush3.bf16.msra.mxu1 %v1878_v62 }
 0xff6   :  { %v929_v53 = vpop.f32.mrb[14].mxu1 }
 0xff7   :  { %v933_v54 = vadd.f32 %v929_v53, %v1912_v17  ;;  %v1508_v55 = vpop.f32.mrb[15].mxu1 }
 0xff9   :  { %1693 = vtanh.f32 %v933_v54  ;;  %v1279_v58 = vmul.f32 -1.442695, %v933_v54 }
 0xffb   :  { %1695 = vpow2.f32 %v1279_v58 }
0x1003   :  { %v1694_v57 = vpop.eup %1693 }
0x1004   :  { %943 = vrot.lane.b32.xlu0 %v1694_v57, %s1722_s4 }
0x1005   :  { %v1696_v60 = vpop.eup %1695 }
0x1006   :  { %v937_v61 = vadd.f32 1.0, %v1696_v60 }
0x1008   :  { %1697 = vrcp.f32 %v937_v61 }
0x1012   :  { %v1698_v59 = vpop.eup %1697 }
0x1013   :  { %v941_v2 = vmul.f32 %v1698_v59, %v851_v49 }
0x1076   :  { %v944_v0 = vpop.permute.xlu0 %943 }
0x1077   :  { %v946_v1 = vmul.f32 %v1698_v59, %v944_v0 }
0x1079   :  { %948 = vrot.lane.b32.xlu1 %v946_v1, %s1723_s24 }
0x10eb   :  { %v949_v62 = vpop.permute.xlu1 %948 }
0x10ec   :  { %v951_v3 = vadd.f32 %v949_v62, %v941_v2 }
0x10ee   :  { %1699 = vtanh.f32 %v951_v3 }
0x10f8   :  { %v1700_v17 = vpop.eup %1699 }
0x10f9   :  { %954 = vrot.lane.b32.xlu0 %v1700_v17, %s1722_s4 }
0x116b   :  { %v955_v4 = vpop.permute.xlu0 %954 }
0x116c   :  { %v957_v5 = vmul.f32 %v1698_v59, %v955_v4 }
0x116e   :  { %959 = vrot.lane.b32.xlu1 %v957_v5, %s1723_s24 }
0x11e0   :  { %v960_v6 = vpop.permute.xlu1 %959 }
0x11e1   :  { %1518 = vmatmul.mubr.msk.f32.vlgmr.msra.gmra.mrb[12].mxu0 %vm359_vm10, %v960_v6 }
0x11e2   :  { %1539 = vmatprep.mubr.msk.f32.mxu0 %vm1720_vm8, %v1721_v63 }
0x12b4   :  { %v1029_v7 = vpop.f32.mrb[12].mxu0 }
0x12b5   :  { %v1033_v8 = vadd.f32 %v1029_v7, %v1918_v23  ;;  %v1519_v9 = vpop.f32.mrb[13].mxu0 }
0x12b7   :  { %1701 = vtanh.f32 %v1033_v8  ;;  %v1281_v11 = vmul.f32 -1.442695, %v1033_v8 }
0x12b9   :  { %1703 = vpow2.f32 %v1281_v11 }
0x12c1   :  { %v1702_v10 = vpop.eup %1701 }
0x12c2   :  { %1043 = vrot.lane.b32.xlu0 %v1702_v10, %s1722_s4 }
0x12c3   :  { %v1704_v12 = vpop.eup %1703 }
0x12c4   :  { %v1037_v14 = vadd.f32 1.0, %v1704_v12 }
0x12c6   :  { %1705 = vrcp.f32 %v1037_v14 }
0x12d0   :  { %v1706_v15 = vpop.eup %1705 }
0x12d1   :  { %v1041_v20 = vmul.f32 %v1706_v15, %v951_v3 }
0x1334   :  { %v1044_v16 = vpop.permute.xlu0 %1043 }
0x1335   :  { %v1046_v18 = vmul.f32 %v1706_v15, %v1044_v16 }
0x1337   :  { %1048 = vrot.lane.b32.xlu1 %v1046_v18, %s1723_s24 }
0x13a9   :  { %v1049_v63 = vpop.permute.xlu1 %1048 }
0x13aa   :  { %v1051_v22 = vadd.f32 %v1049_v63, %v1041_v20 }
0x13ac   :  { %1707 = vtanh.f32 %v1051_v22 }
0x13b6   :  { %v1708_v23 = vpop.eup %1707 }
0x13b7   :  { %1054 = vrot.lane.b32.xlu0 %v1708_v23, %s1722_s4 }
0x1429   :  { %v1055_v24 = vpop.permute.xlu0 %1054 }
0x142a   :  { %v1057_v25 = vmul.f32 %v1706_v15, %v1055_v24 }
0x142c   :  { %1059 = vrot.lane.b32.xlu1 %v1057_v25, %s1723_s24 }
0x149e   :  { %v1060_v26 = vpop.permute.xlu1 %1059 }
0x149f   :  { %1529 = vmatmul.mubr.msk.f32.vlgmr.msra.gmra.mrb[16].mxu1 %vm359_vm10, %v1060_v26 }
0x1572   :  { %v1129_v27 = vpop.f32.mrb[16].mxu1 }
0x1573   :  { %v1133_v28 = vadd.f32 %v1129_v27, %v1916_v21  ;;  %v1530_v29 = vpop.f32.mrb[17].mxu1  ;;  %v30_v21 = vld [vmem:[%s2021_s5] sm:$0xff] }
0x1574   :  { %v1639_v41 = vpack.c.bf16 %v31_v39, %v30_v21 }
0x1575   :  { %1709 = vtanh.f32 %v1133_v28  ;;  %v1283_v31 = vmul.f32 -1.442695, %v1133_v28 }
0x1576   :  { %1640 = vmatpush3.bf16.msra.mxu0 %v1639_v41 }
0x1577   :  { %1711 = vpow2.f32 %v1283_v31  ;;  %1641 = vmatprep.subr.bf16.mxu0 %v1719_v56 }
0x157a   :  { %1643 = vmatpush3.bf16.msra.mxu0 %v1642_v43 }
0x157f   :  { %v1710_v30 = vpop.eup %1709 }
0x1580   :  { %1143 = vrot.lane.b32.xlu0 %v1710_v30, %s1722_s4 }
0x1581   :  { %v1712_v32 = vpop.eup %1711 }
0x1582   :  { %v1137_v33 = vadd.f32 1.0, %v1712_v32 }
0x1584   :  { %1713 = vrcp.f32 %v1137_v33 }
0x158e   :  { %v1714_v13 = vpop.eup %1713 }
0x158f   :  { %v1141_v36 = vmul.f32 %v1714_v13, %v1051_v22 }
0x15f2   :  { %v1144_v34 = vpop.permute.xlu0 %1143 }
0x15f3   :  { %v1146_v35 = vmul.f32 %v1714_v13, %v1144_v34 }
0x15f5   :  { %1148 = vrot.lane.b32.xlu1 %v1146_v35, %s1723_s24 }
0x1667   :  { %v1149_v37 = vpop.permute.xlu1 %1148 }
0x1668   :  { %v1151_v38 = vadd.f32 %v1149_v37, %v1141_v36 }
0x166a   :  { %1715 = vtanh.f32 %v1151_v38 }
0x1674   :  { %v1716_v44 = vpop.eup %1715 }
0x1675   :  { %1154 = vrot.lane.b32.xlu0 %v1716_v44, %s1722_s4 }
0x16e7   :  { %v1155_v45 = vpop.permute.xlu0 %1154 }
0x16e8   :  { %v1157_v46 = vmul.f32 %v1714_v13, %v1155_v45 }
0x16ea   :  { %1165 = vrot.lane.b32.xlu1 %v1157_v46, %s1723_s24 }
0x175c   :  { %v1166_v47 = vpop.permute.xlu1 %1165 }
0x175d   :  { %1540 = vmatmul.mubr.msk.f32.vlgmr.msra.gmra.mrb[14].mxu0 %vm359_vm10, %v1166_v47 }
0x1830   :  { %v1235_v49 = vpop.f32.mrb[14].mxu0 }
0x1831   :  { %v1236_v19 = vadd.f32 %v1284_v48, %v1235_v49  ;;  %v1541_v50 = vpop.f32.mrb[15].mxu0 }
0x1833   :  { %1239 = vst [vmem:[%s2023_s7] sm:$0xff] %v1236_v19 }

</bundles_post_ra>
